<compile_context>
chip_gen: v6e
topology: v6e:2x2x1
jax: 0.10.0
libtpu: 0.0.40
codegen_flags: <defaults>
</compile_context>

<pallas_src>
import functools

import jax
import jax.numpy as jnp
from jax.experimental import pallas as pl
from jax.experimental.pallas import tpu as pltpu


def _down_kernel(x_ref, dw1_w_ref, pw1_w_ref, pw1_b_ref,
                 dw2_w_ref, pw2_w_ref, pw2_b_ref, o_ref):
    _, hh, _, wh, c2 = x_ref.shape
    cin = c2 // 2
    cmid = pw1_w_ref.shape[1]

    # ---- MaxPool2d(2).  Wrapper packed x as (1, Hh, 2, Wh, 2*Cin): the
    # H-phase of the 2x2 window is a major dim (free slices), the W-phase is
    # the two Cin-wide halves of the lane dim (one small lane-slice max).
    xr = x_ref[0]                                   # (Hh, 2, Wh, 2*Cin)
    xh = jnp.maximum(xr[:, 0], xr[:, 1])            # (Hh, Wh, 2*Cin)
    pooled = jnp.maximum(xh[..., :cin], xh[..., cin:])   # (Hh, Wh, Cin)

    def dwconv3x3(inp, w):
        # In-register depthwise 3x3, stride 1, zero pad 1 (bias folded into the
        # pointwise stage).  W+/-1 shifts: sublane roll (XLU) + edge mask.
        # H+/-1 shifts: major-dim slice + zero-row concat (free).
        h, wd, c = inp.shape
        wi = jax.lax.broadcasted_iota(jnp.int32, (h, wd, c), 1)
        # left[h, w]  = inp[h, w-1] (0 at w==0); right[h, w] = inp[h, w+1]
        left = jnp.where(wi > 0, pltpu.roll(inp, shift=1, axis=1), 0.0)
        right = jnp.where(wi < wd - 1, pltpu.roll(inp, shift=wd - 1, axis=1), 0.0)

        def comb(dh):   # contribution of input row r to output row r + (1-dh)
            return left * w[dh, 0] + inp * w[dh, 1] + right * w[dh, 2]

        c_up, c_mid, c_dn = comb(0), comb(1), comb(2)
        zrow = jnp.zeros((1, wd, c), jnp.float32)
        return (c_mid
                + jnp.concatenate([zrow, c_up[:h - 1]], axis=0)   # from row h-1
                + jnp.concatenate([c_dn[1:], zrow], axis=0))      # from row h+1

    # ---- stage 1: dwise1 -> pwise1 (dwise-bias + BN1 folded in) -> ReLU
    a1 = dwconv3x3(pooled, dw1_w_ref[...])
    h1 = jnp.dot(a1.reshape(hh * wh, cin), pw1_w_ref[...],
                 preferred_element_type=jnp.float32)
    h1 = jnp.maximum(h1 + pw1_b_ref[0], 0.0).reshape(hh, wh, cmid)

    # ---- stage 2: dwise2 -> pwise2 (dwise-bias + BN2 folded in) -> ReLU
    a2 = dwconv3x3(h1, dw2_w_ref[...])
    h2 = jnp.dot(a2.reshape(hh * wh, cmid), pw2_w_ref[...],
                 preferred_element_type=jnp.float32)
    # Natural matmul layout (Hh*Wh, Cout): no sublane->lane regroup needed.
    o_ref[0] = jnp.maximum(h2 + pw2_b_ref[0], 0.0)


@functools.lru_cache(maxsize=None)
def _build_down_call(N, Hh, Wh, Cin, Cmid, Cout):
    def full(shape):
        return pl.BlockSpec(shape, lambda n, _s=shape: (0,) * len(_s))

    grid_spec = pltpu.PrefetchScalarGridSpec(
        num_scalar_prefetch=0,
        grid=(N,),
        in_specs=[
            pl.BlockSpec((1, Hh, 2, Wh, 2 * Cin), lambda n: (n, 0, 0, 0, 0)),
            full((3, 3, Cin)), full((Cin, Cmid)), full((1, Cmid)),
            full((3, 3, Cmid)), full((Cmid, Cout)), full((1, Cout)),
        ],
        out_specs=pl.BlockSpec((1, Hh * Wh, Cout), lambda n: (n, 0, 0)),
    )
    return pl.pallas_call(
        _down_kernel,
        out_shape=jax.ShapeDtypeStruct((N, Hh * Wh, Cout), jnp.float32),
        grid_spec=grid_spec,
        # Batch axis is independent -> shard across v7x's 2 TensorCores.
        # No vmem_limit override: blocks here are tens of KiB, defaults leave
        # headroom for compiler scratch on v7x's 64 MiB VMEM.
        compiler_params=pltpu.CompilerParams(
            dimension_semantics=("parallel",)),
    )


def down_forward_nhwc(x_nhwc, params):
    """Down.forward in NHWC (the layout a full U2Net port should keep end-to-end)."""
    x = x_nhwc.astype(jnp.float32)
    N, H, W, Cin = x.shape
    assert H % 2 == 0 and W % 2 == 0, "MaxPool2d(2) kernel assumes even H and W"
    Hh, Wh = H // 2, W // 2
    Cmid = params["pw1_wf"].shape[1]
    Cout = params["pw2_wf"].shape[1]

    # Free, metadata-only reshape: pack the 2x2 pooling window so the H-phase
    # is a major dim and the W-phase sits in the lane dim (no extra HBM copy).
    x_r = x.reshape(N, Hh, 2, Wh, 2 * Cin)
    out = _build_down_call(N, Hh, Wh, Cin, Cmid, Cout)(
        x_r,
        params["dw1_w"], params["pw1_wf"], params["pw1_bf"],
        params["dw2_w"], params["pw2_wf"], params["pw2_bf"])
    return out.reshape(N, Hh, Wh, Cout)        # metadata-only


@jax.jit
def down_forward(x_nchw, params):
    """PyTorch-parity entry point: NCHW in, NCHW out (transposes only here)."""
    x = jnp.transpose(x_nchw, (0, 2, 3, 1))
    out = down_forward_nhwc(x, params)
    return jnp.transpose(out, (0, 3, 1, 2))


# ---------------------------------------------------------------------------
# Parameters
# ---------------------------------------------------------------------------
def init_params(key, cin, cout):
    """Deterministic synthetic raw params for Down(cin, cout), eval-mode BN."""
    cmid = cout  # DoubleConv: mid_channels defaults to out_channels
    ks = jax.random.split(key, 16)

    def u(k, shape, scale):
        return scale * jax.random.uniform(k, shape, jnp.float32, -1.0, 1.0)

    return {
        "dw1_w": u(ks[0], (3, 3, cin), 1.0 / 3.0),
        "dw1_b": u(ks[1], (cin,), 0.1),
        "pw1_w": u(ks[2], (cin, cmid), cin ** -0.5),
        "pw1_b": u(ks[3], (cmid,), 0.1),
        "bn1_gamma": 1.0 + 0.1 * u(ks[4], (cmid,), 1.0),
        "bn1_beta": 0.1 * u(ks[5], (cmid,), 1.0),
        "bn1_mean": 0.1 * u(ks[6], (cmid,), 1.0),
        "bn1_var": 1.0 + 0.1 * jax.random.uniform(ks[7], (cmid,), jnp.float32),
        "dw2_w": u(ks[8], (3, 3, cmid), 1.0 / 3.0),
        "dw2_b": u(ks[9], (cmid,), 0.1),
        "pw2_w": u(ks[10], (cmid, cout), cmid ** -0.5),
        "pw2_b": u(ks[11], (cout,), 0.1),
        "bn2_gamma": 1.0 + 0.1 * u(ks[12], (cout,), 1.0),
        "bn2_beta": 0.1 * u(ks[13], (cout,), 1.0),
        "bn2_mean": 0.1 * u(ks[14], (cout,), 1.0),
        "bn2_var": 1.0 + 0.1 * jax.random.uniform(ks[15], (cout,), jnp.float32),
    }


def fold_params(p, eps=1e-5):
    """Fold dwise bias + eval-mode BatchNorm into the pointwise weights/bias.

    pw_w' = pw_w * bn_scale (per output channel)
    pw_b' = (dw_b @ pw_w + pw_b) * bn_scale + bn_offset
    Exact in eval mode; removes 3 full-tensor VPU ops per stage in the kernel.
    """
    def fold(dw_b, pw_w, pw_b, gamma, beta, mean, var):
        s = gamma / jnp.sqrt(var + eps)
        o = beta - mean * s
        wf = (pw_w * s[None, :]).astype(jnp.float32)
        bf = ((dw_b @ pw_w + pw_b) * s + o).reshape(1, -1).astype(jnp.float32)
        return wf, bf

    pw1_wf, pw1_bf = fold(p["dw1_b"], p["pw1_w"], p["pw1_b"],
                          p["bn1_gamma"], p["bn1_beta"], p["bn1_mean"], p["bn1_var"])
    pw2_wf, pw2_bf = fold(p["dw2_b"], p["pw2_w"], p["pw2_b"],
                          p["bn2_gamma"], p["bn2_beta"], p["bn2_mean"], p["bn2_var"])
    return {
        "dw1_w": p["dw1_w"].astype(jnp.float32), "pw1_wf": pw1_wf, "pw1_bf": pw1_bf,
        "dw2_w": p["dw2_w"].astype(jnp.float32), "pw2_wf": pw2_wf, "pw2_bf": pw2_bf,
    }


# ---------------------------------------------------------------------------
# Pure-JAX reference (original, unfolded math) for the correctness check
# ---------------------------------------------------------------------------
def reference_forward(x_nchw, p, eps=1e-5):
    x = jnp.transpose(x_nchw, (0, 2, 3, 1)).astype(jnp.float32)
    n, h, w, _ = x.shape
    xp = jnp.max(x.reshape(n, h // 2, 2, w // 2, 2, x.shape[-1]), axis=(2, 4))

    def dw(x4, wk, b):
        hh, wh = x4.shape[1], x4.shape[2]
        xpad = jnp.pad(x4, ((0, 0), (1, 1), (1, 1), (0, 0)))
        acc = jnp.zeros_like(x4)
        for dh in range(3):
            for dwi in range(3):
                acc = acc + xpad[:, dh:dh + hh, dwi:dwi + wh, :] * wk[dh, dwi, :]
        return acc + b

    def bn(y, g, b, m, v):
        return g * (y - m) / jnp.sqrt(v + eps) + b

    h1 = dw(xp, p["dw1_w"], p["dw1_b"])
    h1 = jnp.einsum("nhwc,co->nhwo", h1, p["pw1_w"],
                    precision=jax.lax.Precision.HIGHEST) + p["pw1_b"]
    h1 = jnp.maximum(bn(h1, p["bn1_gamma"], p["bn1_beta"],
                        p["bn1_mean"], p["bn1_var"]), 0.0)
    h2 = dw(h1, p["dw2_w"], p["dw2_b"])
    h2 = jnp.einsum("nhwc,co->nhwo", h2, p["pw2_w"],
                    precision=jax.lax.Precision.HIGHEST) + p["pw2_b"]
    h2 = jnp.maximum(bn(h2, p["bn2_gamma"], p["bn2_beta"],
                        p["bn2_mean"], p["bn2_var"]), 0.0)
    return jnp.transpose(h2, (0, 3, 1, 2))


if __name__ == "__main__":
    key = jax.random.PRNGKey(0)
    k_x, k_p = jax.random.split(key)

    N, C_IN, H, W = 2, 8, 16, 16
    C_OUT = 16

    x = jax.random.normal(k_x, (N, C_IN, H, W), jnp.float32)   # NCHW, like PyTorch
    raw_params = init_params(k_p, C_IN, C_OUT)
    params = fold_params(raw_params)

    out = jax.block_until_ready(down_forward(x, params))
    ref = jax.block_until_ready(reference_forward(x, raw_params))

    assert out.shape == (N, C_OUT, H // 2, W // 2), out.shape
    max_err = float(jnp.max(jnp.abs(out - ref)))
    assert jnp.allclose(out, ref, atol=1e-3, rtol=1e-3), max_err

    print("KERNEL_OK")
</pallas_src>

<mosaic_0001>
module attributes {stable_mosaic.version = 11 : i64} {
  func.func @_down_kernel(%arg0: i32, %arg1: memref<1x8x2x8x16xf32, #tpu.memory_space<vmem>>, %arg2: memref<3x3x8xf32, #tpu.memory_space<vmem>>, %arg3: memref<8x16xf32, #tpu.memory_space<vmem>>, %arg4: memref<1x16xf32, #tpu.memory_space<vmem>>, %arg5: memref<3x3x16xf32, #tpu.memory_space<vmem>>, %arg6: memref<16x16xf32, #tpu.memory_space<vmem>>, %arg7: memref<1x16xf32, #tpu.memory_space<vmem>>, %arg8: memref<1x64x16xf32, #tpu.memory_space<vmem>>) attributes {dimension_semantics = [#tpu.dimension_semantics<parallel>], iteration_bounds = array<i64: 2>, scalar_prefetch = 0 : i64, scratch_operands = 0 : i64, tpu.core_type = #tpu.core_type<tc>, window_params = [{transform_indices = @transform_0, window_bounds = array<i64: 1, 8, 2, 8, 16>}, {pipeline_mode = #tpu.pipeline_mode<synchronous>, transform_indices = @transform_1, window_bounds = array<i64: 3, 3, 8>}, {pipeline_mode = #tpu.pipeline_mode<synchronous>, transform_indices = @transform_2, window_bounds = array<i64: 8, 16>}, {pipeline_mode = #tpu.pipeline_mode<synchronous>, transform_indices = @transform_3, window_bounds = array<i64: 1, 16>}, {pipeline_mode = #tpu.pipeline_mode<synchronous>, transform_indices = @transform_4, window_bounds = array<i64: 3, 3, 16>}, {pipeline_mode = #tpu.pipeline_mode<synchronous>, transform_indices = @transform_5, window_bounds = array<i64: 16, 16>}, {pipeline_mode = #tpu.pipeline_mode<synchronous>, transform_indices = @transform_6, window_bounds = array<i64: 1, 16>}, {transform_indices = @transform_7, window_bounds = array<i64: 1, 64, 16>}]} {
    %c0 = arith.constant 0 : index
    %c0_0 = arith.constant 0 : index
    %c0_1 = arith.constant 0 : index
    %c0_2 = arith.constant 0 : index
    %c0_3 = arith.constant 0 : index
    %0 = vector.load %arg1[%c0, %c0_0, %c0_1, %c0_2, %c0_3] : memref<1x8x2x8x16xf32, #tpu.memory_space<vmem>>, vector<1x8x2x8x16xf32>
    %1 = vector.shape_cast %0 : vector<1x8x2x8x16xf32> to vector<8x2x8x16xf32>
    %2 = vector.extract_strided_slice %1 {offsets = [0, 0, 0, 0], sizes = [8, 1, 8, 16], strides = [1, 1, 1, 1]} : vector<8x2x8x16xf32> to vector<8x1x8x16xf32>
    %3 = vector.shape_cast %2 : vector<8x1x8x16xf32> to vector<8x8x16xf32>
    %4 = vector.extract_strided_slice %1 {offsets = [0, 1, 0, 0], sizes = [8, 1, 8, 16], strides = [1, 1, 1, 1]} : vector<8x2x8x16xf32> to vector<8x1x8x16xf32>
    %5 = vector.shape_cast %4 : vector<8x1x8x16xf32> to vector<8x8x16xf32>
    %6 = arith.maximumf %3, %5 : vector<8x8x16xf32>
    %7 = vector.extract_strided_slice %6 {offsets = [0, 0, 0], sizes = [8, 8, 8], strides = [1, 1, 1]} : vector<8x8x16xf32> to vector<8x8x8xf32>
    %8 = vector.extract_strided_slice %6 {offsets = [0, 0, 8], sizes = [8, 8, 8], strides = [1, 1, 1]} : vector<8x8x16xf32> to vector<8x8x8xf32>
    %9 = arith.maximumf %7, %8 : vector<8x8x8xf32>
    %c0_4 = arith.constant 0 : index
    %c0_5 = arith.constant 0 : index
    %c0_6 = arith.constant 0 : index
    %10 = vector.load %arg2[%c0_4, %c0_5, %c0_6] : memref<3x3x8xf32, #tpu.memory_space<vmem>>, vector<3x3x8xf32>
    %11 = tpu.iota {dimensions = array<i32: 1>} : vector<8x8x8xi32>
    %c0_i32 = arith.constant 0 : i32
    %12 = vector.broadcast %c0_i32 : i32 to vector<8x8x8xi32>
    %13 = arith.cmpi sgt, %11, %12 : vector<8x8x8xi32>
    %c1_i32 = arith.constant 1 : i32
    %14 = tpu.dynamic_rotate %9 by %c1_i32 dim 1 : vector<8x8x8xf32>, i32 -> vector<8x8x8xf32>
    %cst = arith.constant 0.000000e+00 : f32
    %15 = vector.broadcast %cst : f32 to vector<8x8x8xf32>
    %16 = arith.select %13, %14, %15 : vector<8x8x8xi1>, vector<8x8x8xf32>
    %c7_i32 = arith.constant 7 : i32
    %17 = vector.broadcast %c7_i32 : i32 to vector<8x8x8xi32>
    %18 = arith.cmpi slt, %11, %17 : vector<8x8x8xi32>
    %c7_i32_7 = arith.constant 7 : i32
    %19 = tpu.dynamic_rotate %9 by %c7_i32_7 dim 1 : vector<8x8x8xf32>, i32 -> vector<8x8x8xf32>
    %cst_8 = arith.constant 0.000000e+00 : f32
    %20 = vector.broadcast %cst_8 : f32 to vector<8x8x8xf32>
    %21 = arith.select %18, %19, %20 : vector<8x8x8xi1>, vector<8x8x8xf32>
    %22 = vector.extract_strided_slice %10 {offsets = [0, 0, 0], sizes = [1, 1, 8], strides = [1, 1, 1]} : vector<3x3x8xf32> to vector<1x1x8xf32>
    %23 = vector.shape_cast %22 : vector<1x1x8xf32> to vector<8xf32>
    %24 = vector.shape_cast %23 : vector<8xf32> to vector<1x1x8xf32>
    %25 = vector.broadcast %24 : vector<1x1x8xf32> to vector<8x8x8xf32>
    %26 = arith.mulf %16, %25 : vector<8x8x8xf32>
    %27 = vector.extract_strided_slice %10 {offsets = [0, 1, 0], sizes = [1, 1, 8], strides = [1, 1, 1]} : vector<3x3x8xf32> to vector<1x1x8xf32>
    %28 = vector.shape_cast %27 : vector<1x1x8xf32> to vector<8xf32>
    %29 = vector.shape_cast %28 : vector<8xf32> to vector<1x1x8xf32>
    %30 = vector.broadcast %29 : vector<1x1x8xf32> to vector<8x8x8xf32>
    %31 = arith.mulf %9, %30 : vector<8x8x8xf32>
    %32 = arith.addf %26, %31 : vector<8x8x8xf32>
    %33 = vector.extract_strided_slice %10 {offsets = [0, 2, 0], sizes = [1, 1, 8], strides = [1, 1, 1]} : vector<3x3x8xf32> to vector<1x1x8xf32>
    %34 = vector.shape_cast %33 : vector<1x1x8xf32> to vector<8xf32>
    %35 = vector.shape_cast %34 : vector<8xf32> to vector<1x1x8xf32>
    %36 = vector.broadcast %35 : vector<1x1x8xf32> to vector<8x8x8xf32>
    %37 = arith.mulf %21, %36 : vector<8x8x8xf32>
    %38 = arith.addf %32, %37 : vector<8x8x8xf32>
    %39 = vector.extract_strided_slice %10 {offsets = [1, 0, 0], sizes = [1, 1, 8], strides = [1, 1, 1]} : vector<3x3x8xf32> to vector<1x1x8xf32>
    %40 = vector.shape_cast %39 : vector<1x1x8xf32> to vector<8xf32>
    %41 = vector.shape_cast %40 : vector<8xf32> to vector<1x1x8xf32>
    %42 = vector.broadcast %41 : vector<1x1x8xf32> to vector<8x8x8xf32>
    %43 = arith.mulf %16, %42 : vector<8x8x8xf32>
    %44 = vector.extract_strided_slice %10 {offsets = [1, 1, 0], sizes = [1, 1, 8], strides = [1, 1, 1]} : vector<3x3x8xf32> to vector<1x1x8xf32>
    %45 = vector.shape_cast %44 : vector<1x1x8xf32> to vector<8xf32>
    %46 = vector.shape_cast %45 : vector<8xf32> to vector<1x1x8xf32>
    %47 = vector.broadcast %46 : vector<1x1x8xf32> to vector<8x8x8xf32>
    %48 = arith.mulf %9, %47 : vector<8x8x8xf32>
    %49 = arith.addf %43, %48 : vector<8x8x8xf32>
    %50 = vector.extract_strided_slice %10 {offsets = [1, 2, 0], sizes = [1, 1, 8], strides = [1, 1, 1]} : vector<3x3x8xf32> to vector<1x1x8xf32>
    %51 = vector.shape_cast %50 : vector<1x1x8xf32> to vector<8xf32>
    %52 = vector.shape_cast %51 : vector<8xf32> to vector<1x1x8xf32>
    %53 = vector.broadcast %52 : vector<1x1x8xf32> to vector<8x8x8xf32>
    %54 = arith.mulf %21, %53 : vector<8x8x8xf32>
    %55 = arith.addf %49, %54 : vector<8x8x8xf32>
    %56 = vector.extract_strided_slice %10 {offsets = [2, 0, 0], sizes = [1, 1, 8], strides = [1, 1, 1]} : vector<3x3x8xf32> to vector<1x1x8xf32>
    %57 = vector.shape_cast %56 : vector<1x1x8xf32> to vector<8xf32>
    %58 = vector.shape_cast %57 : vector<8xf32> to vector<1x1x8xf32>
    %59 = vector.broadcast %58 : vector<1x1x8xf32> to vector<8x8x8xf32>
    %60 = arith.mulf %16, %59 : vector<8x8x8xf32>
    %61 = vector.extract_strided_slice %10 {offsets = [2, 1, 0], sizes = [1, 1, 8], strides = [1, 1, 1]} : vector<3x3x8xf32> to vector<1x1x8xf32>
    %62 = vector.shape_cast %61 : vector<1x1x8xf32> to vector<8xf32>
    %63 = vector.shape_cast %62 : vector<8xf32> to vector<1x1x8xf32>
    %64 = vector.broadcast %63 : vector<1x1x8xf32> to vector<8x8x8xf32>
    %65 = arith.mulf %9, %64 : vector<8x8x8xf32>
    %66 = arith.addf %60, %65 : vector<8x8x8xf32>
    %67 = vector.extract_strided_slice %10 {offsets = [2, 2, 0], sizes = [1, 1, 8], strides = [1, 1, 1]} : vector<3x3x8xf32> to vector<1x1x8xf32>
    %68 = vector.shape_cast %67 : vector<1x1x8xf32> to vector<8xf32>
    %69 = vector.shape_cast %68 : vector<8xf32> to vector<1x1x8xf32>
    %70 = vector.broadcast %69 : vector<1x1x8xf32> to vector<8x8x8xf32>
    %71 = arith.mulf %21, %70 : vector<8x8x8xf32>
    %72 = arith.addf %66, %71 : vector<8x8x8xf32>
    %cst_9 = arith.constant 0.000000e+00 : f32
    %73 = vector.broadcast %cst_9 : f32 to vector<1x8x8xf32>
    %74 = vector.extract_strided_slice %38 {offsets = [0, 0, 0], sizes = [7, 8, 8], strides = [1, 1, 1]} : vector<8x8x8xf32> to vector<7x8x8xf32>
    %75 = tpu.concatenate %73, %74 in 0 : vector<1x8x8xf32>, vector<7x8x8xf32> -> vector<8x8x8xf32>
    %76 = arith.addf %55, %75 : vector<8x8x8xf32>
    %77 = vector.extract_strided_slice %72 {offsets = [1, 0, 0], sizes = [7, 8, 8], strides = [1, 1, 1]} : vector<8x8x8xf32> to vector<7x8x8xf32>
    %78 = tpu.concatenate %77, %73 in 0 : vector<7x8x8xf32>, vector<1x8x8xf32> -> vector<8x8x8xf32>
    %79 = arith.addf %76, %78 : vector<8x8x8xf32>
    %80 = vector.shape_cast %79 : vector<8x8x8xf32> to vector<64x8xf32>
    %c0_10 = arith.constant 0 : index
    %c0_11 = arith.constant 0 : index
    %81 = vector.load %arg3[%c0_10, %c0_11] : memref<8x16xf32, #tpu.memory_space<vmem>>, vector<8x16xf32>
    %cst_12 = arith.constant dense<0.000000e+00> : vector<64x16xf32>
    %82 = tpu.matmul %80, %81, %cst_12 {dimension_numbers = #tpu.dot_dimension_numbers<[1], [0], [0], [1], [0, 0, 1, 1], [], []>} : vector<64x8xf32>, vector<8x16xf32>, vector<64x16xf32> -> vector<64x16xf32>
    %c0_13 = arith.constant 0 : index
    %c0_14 = arith.constant 0 : index
    %83 = vector.load %arg4[%c0_13, %c0_14] : memref<1x16xf32, #tpu.memory_space<vmem>>, vector<1x16xf32>
    %84 = vector.shape_cast %83 : vector<1x16xf32> to vector<16xf32>
    %85 = vector.shape_cast %84 : vector<16xf32> to vector<1x16xf32>
    %86 = vector.broadcast %85 : vector<1x16xf32> to vector<64x16xf32>
    %87 = arith.addf %82, %86 : vector<64x16xf32>
    %cst_15 = arith.constant 0.000000e+00 : f32
    %88 = vector.broadcast %cst_15 : f32 to vector<64x16xf32>
    %89 = arith.maximumf %87, %88 : vector<64x16xf32>
    %90 = vector.shape_cast %89 : vector<64x16xf32> to vector<8x8x16xf32>
    %c0_16 = arith.constant 0 : index
    %c0_17 = arith.constant 0 : index
    %c0_18 = arith.constant 0 : index
    %91 = vector.load %arg5[%c0_16, %c0_17, %c0_18] : memref<3x3x16xf32, #tpu.memory_space<vmem>>, vector<3x3x16xf32>
    %92 = tpu.iota {dimensions = array<i32: 1>} : vector<8x8x16xi32>
    %c0_i32_19 = arith.constant 0 : i32
    %93 = vector.broadcast %c0_i32_19 : i32 to vector<8x8x16xi32>
    %94 = arith.cmpi sgt, %92, %93 : vector<8x8x16xi32>
    %c1_i32_20 = arith.constant 1 : i32
    %95 = tpu.dynamic_rotate %90 by %c1_i32_20 dim 1 : vector<8x8x16xf32>, i32 -> vector<8x8x16xf32>
    %cst_21 = arith.constant 0.000000e+00 : f32
    %96 = vector.broadcast %cst_21 : f32 to vector<8x8x16xf32>
    %97 = arith.select %94, %95, %96 : vector<8x8x16xi1>, vector<8x8x16xf32>
    %c7_i32_22 = arith.constant 7 : i32
    %98 = vector.broadcast %c7_i32_22 : i32 to vector<8x8x16xi32>
    %99 = arith.cmpi slt, %92, %98 : vector<8x8x16xi32>
    %c7_i32_23 = arith.constant 7 : i32
    %100 = tpu.dynamic_rotate %90 by %c7_i32_23 dim 1 : vector<8x8x16xf32>, i32 -> vector<8x8x16xf32>
    %cst_24 = arith.constant 0.000000e+00 : f32
    %101 = vector.broadcast %cst_24 : f32 to vector<8x8x16xf32>
    %102 = arith.select %99, %100, %101 : vector<8x8x16xi1>, vector<8x8x16xf32>
    %103 = vector.extract_strided_slice %91 {offsets = [0, 0, 0], sizes = [1, 1, 16], strides = [1, 1, 1]} : vector<3x3x16xf32> to vector<1x1x16xf32>
    %104 = vector.shape_cast %103 : vector<1x1x16xf32> to vector<16xf32>
    %105 = vector.shape_cast %104 : vector<16xf32> to vector<1x1x16xf32>
    %106 = vector.broadcast %105 : vector<1x1x16xf32> to vector<8x8x16xf32>
    %107 = arith.mulf %97, %106 : vector<8x8x16xf32>
    %108 = vector.extract_strided_slice %91 {offsets = [0, 1, 0], sizes = [1, 1, 16], strides = [1, 1, 1]} : vector<3x3x16xf32> to vector<1x1x16xf32>
    %109 = vector.shape_cast %108 : vector<1x1x16xf32> to vector<16xf32>
    %110 = vector.shape_cast %109 : vector<16xf32> to vector<1x1x16xf32>
    %111 = vector.broadcast %110 : vector<1x1x16xf32> to vector<8x8x16xf32>
    %112 = arith.mulf %90, %111 : vector<8x8x16xf32>
    %113 = arith.addf %107, %112 : vector<8x8x16xf32>
    %114 = vector.extract_strided_slice %91 {offsets = [0, 2, 0], sizes = [1, 1, 16], strides = [1, 1, 1]} : vector<3x3x16xf32> to vector<1x1x16xf32>
    %115 = vector.shape_cast %114 : vector<1x1x16xf32> to vector<16xf32>
    %116 = vector.shape_cast %115 : vector<16xf32> to vector<1x1x16xf32>
    %117 = vector.broadcast %116 : vector<1x1x16xf32> to vector<8x8x16xf32>
    %118 = arith.mulf %102, %117 : vector<8x8x16xf32>
    %119 = arith.addf %113, %118 : vector<8x8x16xf32>
    %120 = vector.extract_strided_slice %91 {offsets = [1, 0, 0], sizes = [1, 1, 16], strides = [1, 1, 1]} : vector<3x3x16xf32> to vector<1x1x16xf32>
    %121 = vector.shape_cast %120 : vector<1x1x16xf32> to vector<16xf32>
    %122 = vector.shape_cast %121 : vector<16xf32> to vector<1x1x16xf32>
    %123 = vector.broadcast %122 : vector<1x1x16xf32> to vector<8x8x16xf32>
    %124 = arith.mulf %97, %123 : vector<8x8x16xf32>
    %125 = vector.extract_strided_slice %91 {offsets = [1, 1, 0], sizes = [1, 1, 16], strides = [1, 1, 1]} : vector<3x3x16xf32> to vector<1x1x16xf32>
    %126 = vector.shape_cast %125 : vector<1x1x16xf32> to vector<16xf32>
    %127 = vector.shape_cast %126 : vector<16xf32> to vector<1x1x16xf32>
    %128 = vector.broadcast %127 : vector<1x1x16xf32> to vector<8x8x16xf32>
    %129 = arith.mulf %90, %128 : vector<8x8x16xf32>
    %130 = arith.addf %124, %129 : vector<8x8x16xf32>
    %131 = vector.extract_strided_slice %91 {offsets = [1, 2, 0], sizes = [1, 1, 16], strides = [1, 1, 1]} : vector<3x3x16xf32> to vector<1x1x16xf32>
    %132 = vector.shape_cast %131 : vector<1x1x16xf32> to vector<16xf32>
    %133 = vector.shape_cast %132 : vector<16xf32> to vector<1x1x16xf32>
    %134 = vector.broadcast %133 : vector<1x1x16xf32> to vector<8x8x16xf32>
    %135 = arith.mulf %102, %134 : vector<8x8x16xf32>
    %136 = arith.addf %130, %135 : vector<8x8x16xf32>
    %137 = vector.extract_strided_slice %91 {offsets = [2, 0, 0], sizes = [1, 1, 16], strides = [1, 1, 1]} : vector<3x3x16xf32> to vector<1x1x16xf32>
    %138 = vector.shape_cast %137 : vector<1x1x16xf32> to vector<16xf32>
    %139 = vector.shape_cast %138 : vector<16xf32> to vector<1x1x16xf32>
    %140 = vector.broadcast %139 : vector<1x1x16xf32> to vector<8x8x16xf32>
    %141 = arith.mulf %97, %140 : vector<8x8x16xf32>
    %142 = vector.extract_strided_slice %91 {offsets = [2, 1, 0], sizes = [1, 1, 16], strides = [1, 1, 1]} : vector<3x3x16xf32> to vector<1x1x16xf32>
    %143 = vector.shape_cast %142 : vector<1x1x16xf32> to vector<16xf32>
    %144 = vector.shape_cast %143 : vector<16xf32> to vector<1x1x16xf32>
    %145 = vector.broadcast %144 : vector<1x1x16xf32> to vector<8x8x16xf32>
    %146 = arith.mulf %90, %145 : vector<8x8x16xf32>
    %147 = arith.addf %141, %146 : vector<8x8x16xf32>
    %148 = vector.extract_strided_slice %91 {offsets = [2, 2, 0], sizes = [1, 1, 16], strides = [1, 1, 1]} : vector<3x3x16xf32> to vector<1x1x16xf32>
    %149 = vector.shape_cast %148 : vector<1x1x16xf32> to vector<16xf32>
    %150 = vector.shape_cast %149 : vector<16xf32> to vector<1x1x16xf32>
    %151 = vector.broadcast %150 : vector<1x1x16xf32> to vector<8x8x16xf32>
    %152 = arith.mulf %102, %151 : vector<8x8x16xf32>
    %153 = arith.addf %147, %152 : vector<8x8x16xf32>
    %cst_25 = arith.constant 0.000000e+00 : f32
    %154 = vector.broadcast %cst_25 : f32 to vector<1x8x16xf32>
    %155 = vector.extract_strided_slice %119 {offsets = [0, 0, 0], sizes = [7, 8, 16], strides = [1, 1, 1]} : vector<8x8x16xf32> to vector<7x8x16xf32>
    %156 = tpu.concatenate %154, %155 in 0 : vector<1x8x16xf32>, vector<7x8x16xf32> -> vector<8x8x16xf32>
    %157 = arith.addf %136, %156 : vector<8x8x16xf32>
    %158 = vector.extract_strided_slice %153 {offsets = [1, 0, 0], sizes = [7, 8, 16], strides = [1, 1, 1]} : vector<8x8x16xf32> to vector<7x8x16xf32>
    %159 = tpu.concatenate %158, %154 in 0 : vector<7x8x16xf32>, vector<1x8x16xf32> -> vector<8x8x16xf32>
    %160 = arith.addf %157, %159 : vector<8x8x16xf32>
    %161 = vector.shape_cast %160 : vector<8x8x16xf32> to vector<64x16xf32>
    %c0_26 = arith.constant 0 : index
    %c0_27 = arith.constant 0 : index
    %162 = vector.load %arg6[%c0_26, %c0_27] : memref<16x16xf32, #tpu.memory_space<vmem>>, vector<16x16xf32>
    %cst_28 = arith.constant dense<0.000000e+00> : vector<64x16xf32>
    %163 = tpu.matmul %161, %162, %cst_28 {dimension_numbers = #tpu.dot_dimension_numbers<[1], [0], [0], [1], [0, 0, 1, 1], [], []>} : vector<64x16xf32>, vector<16x16xf32>, vector<64x16xf32> -> vector<64x16xf32>
    %c0_29 = arith.constant 0 : index
    %c0_30 = arith.constant 0 : index
    %164 = vector.load %arg7[%c0_29, %c0_30] : memref<1x16xf32, #tpu.memory_space<vmem>>, vector<1x16xf32>
    %165 = vector.shape_cast %164 : vector<1x16xf32> to vector<16xf32>
    %166 = vector.shape_cast %165 : vector<16xf32> to vector<1x16xf32>
    %167 = vector.broadcast %166 : vector<1x16xf32> to vector<64x16xf32>
    %168 = arith.addf %163, %167 : vector<64x16xf32>
    %cst_31 = arith.constant 0.000000e+00 : f32
    %169 = vector.broadcast %cst_31 : f32 to vector<64x16xf32>
    %170 = arith.maximumf %168, %169 : vector<64x16xf32>
    %c0_32 = arith.constant 0 : index
    %c0_33 = arith.constant 0 : index
    %c0_34 = arith.constant 0 : index
    %171 = vector.load %arg8[%c0_32, %c0_33, %c0_34] : memref<1x64x16xf32, #tpu.memory_space<vmem>>, vector<1x64x16xf32>
    %172 = vector.shape_cast %171 : vector<1x64x16xf32> to vector<64x16xf32>
    %173 = vector.shape_cast %170 : vector<64x16xf32> to vector<1x64x16xf32>
    tpu.vector_store %arg8[%c0_32, %c0_33, %c0_34], %173 {strides = array<i32>} : memref<1x64x16xf32, #tpu.memory_space<vmem>>, vector<1x64x16xf32>,
    return
  }
  func.func @transform_0(%arg0: i32) -> (i32, i32, i32, i32, i32) {
    %c0_i32 = arith.constant 0 : i32
    %c0_i32_0 = arith.constant 0 : i32
    %c0_i32_1 = arith.constant 0 : i32
    %c0_i32_2 = arith.constant 0 : i32
    %c0_i32_3 = arith.constant 0 : i32
    return %arg0, %c0_i32, %c0_i32_0, %c0_i32_1, %c0_i32_2 : i32, i32, i32, i32, i32
  }
  func.func @transform_1(%arg0: i32) -> (i32, i32, i32) {
    %c0_i32 = arith.constant 0 : i32
    %c0_i32_0 = arith.constant 0 : i32
    %c0_i32_1 = arith.constant 0 : i32
    %c0_i32_2 = arith.constant 0 : i32
    return %c0_i32, %c0_i32_0, %c0_i32_1 : i32, i32, i32
  }
  func.func @transform_2(%arg0: i32) -> (i32, i32) {
    %c0_i32 = arith.constant 0 : i32
    %c0_i32_0 = arith.constant 0 : i32
    %c0_i32_1 = arith.constant 0 : i32
    return %c0_i32, %c0_i32_0 : i32, i32
  }
  func.func @transform_3(%arg0: i32) -> (i32, i32) {
    %c0_i32 = arith.constant 0 : i32
    %c0_i32_0 = arith.constant 0 : i32
    %c0_i32_1 = arith.constant 0 : i32
    return %c0_i32, %c0_i32_0 : i32, i32
  }
  func.func @transform_4(%arg0: i32) -> (i32, i32, i32) {
    %c0_i32 = arith.constant 0 : i32
    %c0_i32_0 = arith.constant 0 : i32
    %c0_i32_1 = arith.constant 0 : i32
    %c0_i32_2 = arith.constant 0 : i32
    return %c0_i32, %c0_i32_0, %c0_i32_1 : i32, i32, i32
  }
  func.func @transform_5(%arg0: i32) -> (i32, i32) {
    %c0_i32 = arith.constant 0 : i32
    %c0_i32_0 = arith.constant 0 : i32
    %c0_i32_1 = arith.constant 0 : i32
    return %c0_i32, %c0_i32_0 : i32, i32
  }
  func.func @transform_6(%arg0: i32) -> (i32, i32) {
    %c0_i32 = arith.constant 0 : i32
    %c0_i32_0 = arith.constant 0 : i32
    %c0_i32_1 = arith.constant 0 : i32
    return %c0_i32, %c0_i32_0 : i32, i32
  }
  func.func @transform_7(%arg0: i32) -> (i32, i32, i32) {
    %c0_i32 = arith.constant 0 : i32
    %c0_i32_0 = arith.constant 0 : i32
    %c0_i32_1 = arith.constant 0 : i32
    return %arg0, %c0_i32, %c0_i32_0 : i32, i32, i32
  }
}

</mosaic_0001>

<bundles_post_ra>
// kernel: down_forward.1
= control target key start
LH: loop header
LB: loop body
LE: loop exit
PB: predicated region body
PF: predicated region fallthrough
CT: control target
= control target key end

     0   :  { %12 = vsyncpa [#allocation3], 0  ;;  %s2007_s0 = inlined_call_operand.vmem [shape: f32[2,8,2,8,16], index: 0, kind: input, shape index: {}]   ;;  %s2008_s1 = inlined_call_operand.vmem [shape: f32[3,3,8], index: 1, kind: input, shape index: {}]   ;;  %s2009_s2 = inlined_call_operand.vmem [shape: f32[8,16], index: 2, kind: input, shape index: {}]   ;;  %s2010_s3 = inlined_call_operand.vmem [shape: f32[1,16], index: 3, kind: input, shape index: {}]   ;;  %s2011_s4 = inlined_call_operand.vmem [shape: f32[3,3,16], index: 4, kind: input, shape index: {}]   ;;  %s2012_s5 = inlined_call_operand.vmem [shape: f32[16,16], index: 5, kind: input, shape index: {}]   ;;  %s2013_s6 = inlined_call_operand.vmem [shape: f32[1,16], index: 6, kind: input, shape index: {}]   ;;  %s2014_s7 = inlined_call_operand.hbm [shape: f32[2,64,16], index: 7, kind: output, shape index: {}]  }
   0x1   :  { %14 = vsyncpa [#allocation3 + $0x1], 0  ;;  %s1345_s24 = smov 0   ;;  %s1347_s25 = smov 0  }
   0x2   :  { %s1349_s26 = smov 0   ;;  %s1351_s27 = smov 0  }
   0x3 LB: > { %s1366_s28 = sadd.s32 4294967295, %s1299_s27   ;;  %s1116_s29 = sadd.s32 4294967294, %s1299_s27   ;;  %s1299_s27 = sphi %s1351_s27, %s2027_s27   ;;  %s1295_s26 = sphi %s1349_s26, %s2026_s26   ;;  %s1291_s25 = sphi %s1347_s25, %s2025_s25   ;;  %s1287_s24 = sphi %s1345_s24, %s2024_s24  }
   0x4   : > { %s1370_s30 = sadd.s32 1, %s1299_s27   ;;  %s179_s8 = sadd.s32 1, %s1295_s26 }
   0x5   : > { %s176_s9 = ssub.s32 %s1299_s27, %s1370_s30  ;;  %p189_p0 = scmp.ne.s32.totalorder %s1295_s26, %s1291_s25 }
   0x6   : > { %p177_p1 = scmp.eq.s32.totalorder %s176_s9, 0  ;;  %p190_p2 = scmp.eq.s32.totalorder %s1366_s28, 1 }
   0x7   : > { %p195_p3 = scmp.ne.s32.totalorder %s1291_s25, %s1287_s24  ;;  %p196_p4 = scmp.eq.s32.totalorder %s1116_s29, 1 }
   0x8   : > { %s1381_s10 = scalar_select %p177_p1, %s1295_s26, %s179_s8  }
   0x9   : > { %p1383_p5 = por %p190_p2, %p189_p0  ;;  %p1387_p6 = por %p196_p4, %p195_p3 }
   0xa   : > { %p1119_p7 = scmp.ge.s32.totalorder %s1299_s27, 1  ;;  %p240_p8 = scmp.lt.s32.totalorder %s1299_s27, 3 }
   0xc   : > { %p241_p9 = pnand %p1119_p7, %p240_p8 }
   0xe   : > { %244 = sbr.rel (%p241_p9) target bundleno = 628 (0x274), region = 48 }
  0x13   : > { %p272_p10 = scmp.lt.s32.totalorder %s1366_s28, 1  ;;  %s1301_s18 = smov 120   ;;  %v542_v17 = vld [vmem:[%s2009_s2] sm:$0xff]  ;;  %v344_v25 = vlaneseq  ;;  %v343_v30 = vld [vmem:[%s2008_s1 + $0x8] sm:$0x7]  ;;  %vm550_vm2 = vcmask 64512  }
  0x14   : > { %1167 = vmatprep.subr.mxu0 %v542_v17  ;;  %v341_v27 = vld [vmem:[%s2008_s1] sm:$0x7]  ;;  %v342_v29 = vld [vmem:[%s2008_s1 + $0x4] sm:$0x7]  ;;  %vm894_vm3 = vcmask 130048   ;;  %s269_s8 = sand.u32 1, %s1291_s25  }
  0x15   : > { %s273_s13 = scalar_select %p272_p10, %s1366_s28, 1  ;;  %1168 = vmatpush3.msra.mxu0 %v542_v17  ;;  %v1413_v26 = vshrl.u32 %v344_v25, 7 }
  0x16   : > { %s1147_s16 = sshll.u32 %s1366_s28, 10  ;;  %s1967_s28 = scalar_lea.sflag [#allocation3], %s269_s8 }
  0x17   : > { %s1146_s14 = sshll.u32 %s273_s13, 7  ;;  %v1419_v28 = vsub.s32 1, %v1413_v26  ;;  %v1428_v31 = vsub.s32 0, %v1413_v26  ;;  %v1431_v32 = vsub.s32 2, %v1413_v26  ;;  %vm346_vm0 = vcmp.gt.s32.totalorder %v1413_v26, 0  ;;  %s1957_s20 = scalar_lea.hbm %s2014_s7, %s1147_s16 }
  0x18   : > { %s276_s17 = scalar_lea.vmem %s2007_s0, %s1146_s14  ;;  %vm363_vm1 = vcmp.lt.s32.totalorder %v1413_v26, 7  ;;  %s1120_s14 = sshll.u32 %s269_s8, 6 }
  0x19   : > { %v281_v0 = vld [vmem:[%s276_s17 + $0x20] sm:$0xff]  ;;  %v282_v1 = vld [vmem:[%s276_s17 + $0x28] sm:$0xff]  ;;  %v283_v5 = vld [vmem:[%s276_s17 + $0x30] sm:$0xff]  ;;  %2019 = vst [vmem:[#allocation5_spill] sm:$0xff] %v1431_v32  ;;  %v1435_v33 = vrot.slane %v341_v27, %v1419_v28  ;;  %v1438_v34 = vrot.slane %v342_v29, %v1419_v28  ;;  %v1441_v35 = vrot.slane %v343_v30, %v1419_v28  ;;  %v1445_v39 = vrot.slane %v342_v29, %v1428_v31  ;;  %s1938_s15 = scalar_lea.vmem [#allocation2], %s1120_s14  ;;  %s1302_s22 = smov [#allocation2]  }
  0x1a   : > { %v277_v2 = vld [vmem:[%s276_s17] sm:$0xff]  ;;  %v295_v3 = vmax.f32 %v281_v0, %v282_v1  ;;  %v278_v4 = vld [vmem:[%s276_s17 + $0x8] sm:$0xff]  ;;  %v284_v6 = vld [vmem:[%s276_s17 + $0x38] sm:$0xff]  ;;  %v1448_v40 = vrot.slane %v343_v30, %v1428_v31  ;;  %v1451_v41 = vrot.slane %v341_v27, %v1428_v31  ;;  %v1454_v43 = vrot.slane %v341_v27, %v1431_v32  ;;  %s1243_s23 = sshll.u32 %s1302_s22, 4  ;;  %s1244_s23 = int_to_ptr.vmem [resolvable:$false] %s1243_s23 }
  0x1b   : > { %v293_v7 = vmax.f32 %v277_v2, %v278_v4  ;;  %v279_v8 = vld [vmem:[%s276_s17 + $0x10] sm:$0xff]  ;;  %v280_v9 = vld [vmem:[%s276_s17 + $0x18] sm:$0xff]  ;;  %v296_v10 = vmax.f32 %v283_v5, %v284_v6  ;;  %v285_v14 = vld [vmem:[%s276_s17 + $0x40] sm:$0xff]  ;;  %v1457_v44 = vrot.slane %v342_v29, %v1431_v32  ;;  %v1460_v45 = vrot.slane %v343_v30, %v1431_v32  ;;  %s1245_s29 = scalar_lea.vmem %s1244_s23, 2048 }
  0x1c   : > { %313 = vrot.lane.b32.xlu1 %v295_v3, %s1301_s18  ;;  %v294_v11 = vmax.f32 %v279_v8, %v280_v9  ;;  %v287_v12 = vld [vmem:[%s276_s17 + $0x50] sm:$0xff]  ;;  %v288_v13 = vld [vmem:[%s276_s17 + $0x58] sm:$0xff]  ;;  %v286_v15 = vld [vmem:[%s276_s17 + $0x48] sm:$0xff] }
  0x1d   : > { %309 = vrot.lane.b32.xlu0 %v293_v7, %s1301_s18  ;;  %v1398_v16 = vmax.f32 %v287_v12, %v288_v13  ;;  %v1403_v18 = vmax.f32 %v285_v14, %v286_v15  ;;  %v291_v19 = vld [vmem:[%s276_s17 + $0x70] sm:$0xff]  ;;  %v292_v20 = vld [vmem:[%s276_s17 + $0x78] sm:$0xff]  ;;  %v289_v21 = vld [vmem:[%s276_s17 + $0x60] sm:$0xff] }
  0x1e   : > { %v290_v22 = vld [vmem:[%s276_s17 + $0x68] sm:$0xff]  ;;  %v1406_v23 = vmax.f32 %v291_v19, %v292_v20  ;;  %s1054_s17 = sshll.u32 %s1938_s15, 4  ;;  %s1959_s17 = int_to_ptr.vmem [resolvable:$true] %s1054_s17 }
  0x1f   : > { %v1409_v24 = vmax.f32 %v289_v21, %v290_v22  ;;  %s1239_s21 = scalar_lea.vmem %s1959_s17, 1024  ;;  %p1246_p0 = scmp.lt.s32.totalorder %s1959_s17, %s1244_s23 }
  0x20   : > { %315 = vrot.lane.b32.xlu1 %v296_v10, %s1301_s18  ;;  %p1240_p11 = scmp.ne.s32.totalorder %s1959_s17, %s1239_s21  ;;  %p1247_p1 = scmp.lt.s32.totalorder %s1245_s29, %s1239_s21 }
  0x21   : > { %311 = vrot.lane.b32.xlu0 %v294_v11, %s1301_s18 }
  0x22   : > { %p1241_p12 = pnand %p1240_p11, %p1383_p5  ;;  %p1248_p2 = por %p1247_p1, %p1246_p0 }
  0x24   : > { %319 = vrot.lane.b32.xlu1 %v1398_v16, %s1301_s18  ;;  %p1242_p13 = pneg %p1241_p12 }
  0x25   : > { %317 = vrot.lane.b32.xlu0 %v1403_v18, %s1301_s18 }
  0x26   : > { %p1249_p3 = pnand %p1248_p2, %p1242_p13 }
  0x28   : > { %323 = vrot.lane.b32.xlu1 %v1406_v23, %s1301_s18 }
  0x29   : > { %321 = vrot.lane.b32.xlu0 %v1409_v24, %s1301_s18 }
  0x8e   : > { %v314_v36 = vpop.permute.xlu1 %313 }
  0x8f   : > { %v335_v37 = vmax.f32 %v295_v3, %v314_v36  ;;  %v310_v38 = vpop.permute.xlu0 %309 }
  0x90   : > { %v333_v42 = vmax.f32 %v293_v7, %v310_v38 }
  0x91   : > { %v349_v46 = vrot.slane %v335_v37, 7  ;;  %v366_v47 = vrot.slane %v335_v37, 1  ;;  %v1463_v48 = vmul.f32 %v1435_v33, %v335_v37  ;;  %v1466_v49 = vmul.f32 %v1438_v34, %v335_v37 }
  0x92   : > { %v1469_v50 = vmul.f32 %v1441_v35, %v335_v37  ;;  %v347_v51 = vrot.slane %v333_v42, 7  ;;  %v395_v52 = vmul.f32 %v1435_v33, %v333_v42  ;;  %v316_v53 = vpop.permute.xlu1 %315  ;;  %v364_v54 = vrot.slane %v333_v42, 1 }
  0x93   : > { %v1474_v55 = vsel %vm346_vm0, %v349_v46, 0.0  ;;  %v1476_v56 = vmax.f32 %v296_v10, %v316_v53  ;;  %v312_v57 = vpop.permute.xlu0 %311  ;;  %v443_v58 = vmul.f32 %v1438_v34, %v333_v42  ;;  %v1481_v59 = vsel %vm363_vm1, %v366_v47, 0.0 }
  0x94   : > { %v1483_v60 = vmax.f32 %v294_v11, %v312_v57  ;;  %v355_v61 = vsel %vm346_vm0, %v347_v51, 0.0  ;;  %v372_v62 = vsel %vm363_vm1, %v364_v54, 0.0  ;;  %v1491_v63 = vmul.f32 %v1448_v40, %v1474_v55 }
  0x95   : > { %v350_v0 = vrot.slane %v1476_v56, 7  ;;  %v1497_v2 = vmul.f32 %v1435_v33, %v1476_v56  ;;  %v1501_v3 = vmul.f32 %v1438_v34, %v1476_v56  ;;  %v1505_v4 = vmul.f32 %v1441_v35, %v1476_v56 }
  0x96   : > { %v1509_v5 = vmul.f32 %v1435_v33, %v1483_v60  ;;  %v444_v6 = vmul.f32 %v1438_v34, %v1483_v60  ;;  %v320_v7 = vpop.permute.xlu1 %319  ;;  %v348_v8 = vrot.slane %v1483_v60, 7  ;;  %v365_v12 = vrot.slane %v1483_v60, 1 }
  0x97   : > { %v1516_v9 = vsel %vm346_vm0, %v350_v0, 0.0  ;;  %v1519_v10 = vmax.f32 %v1398_v16, %v320_v7  ;;  %v318_v11 = vpop.permute.xlu0 %317  ;;  %v384_v13 = vmul.f32 %v1451_v41, %v355_v61  ;;  %v413_v17 = vmul.f32 %v1454_v43, %v372_v62 }
  0x98   : > { %v1524_v14 = vmax.f32 %v1403_v18, %v318_v11  ;;  %v356_v15 = vsel %vm346_vm0, %v348_v8, 0.0  ;;  %v431_v19 = vmul.f32 %v1445_v39, %v355_v61  ;;  %v373_v53 = vsel %vm363_vm1, %v365_v12, 0.0 }
  0x99   : > { %v352_v20 = vrot.slane %v1519_v10, 7  ;;  %v1534_v21 = vmul.f32 %v1435_v33, %v1519_v10  ;;  %v1538_v22 = vmul.f32 %v1438_v34, %v1519_v10  ;;  %v1542_v18 = vmul.f32 %v1441_v35, %v1519_v10 }
  0x9a   : > { %v351_v25 = vrot.slane %v1524_v14, 7  ;;  %v368_v27 = vrot.slane %v1524_v14, 1  ;;  %v1548_v29 = vmul.f32 %v1435_v33, %v1524_v14  ;;  %v324_v30 = vpop.permute.xlu1 %323  ;;  %v1556_v37 = vmul.f32 %v1438_v34, %v1524_v14 }
  0x9b   : > { %v1552_v36 = vsel %vm346_vm0, %v352_v20, 0.0  ;;  %v1560_v38 = vmul.f32 %v1441_v35, %v1524_v14  ;;  %v340_v42 = vmax.f32 %v1406_v23, %v324_v30  ;;  %v322_v46 = vpop.permute.xlu0 %321  ;;  %v385_v54 = vmul.f32 %v1451_v41, %v356_v15 }
  0x9c   : > { %v1565_v47 = vsel %vm346_vm0, %v351_v25, 0.0  ;;  %v1568_v51 = vmax.f32 %v1409_v24, %v322_v46  ;;  %v402_v25 = vadd.f32 %v395_v52, %v384_v13  ;;  %v463_v8 = vmul.f32 %v1457_v44, %v372_v62 }
  0x9d   : > { %v354_v57 = vrot.slane %v340_v42, 7  ;;  %v371_v61 = vrot.slane %v340_v42, 1  ;;  %v450_v0 = vmul.f32 %v1438_v34, %v340_v42  ;;  %v500_v7 = vmul.f32 %v1441_v35, %v340_v42 }
  0x9e   : > { %v353_v23 = vrot.slane %v1568_v51, 7  ;;  %v1579_v11 = vmul.f32 %v1435_v33, %v1568_v51  ;;  %v1583_v24 = vmul.f32 %v1438_v34, %v1568_v51  ;;  %v1593_v20 = vmul.f32 %v1441_v35, %v1568_v51 }
  0x9f   : > { %v362_v12 = vsel %vm346_vm0, %v354_v57, 0.0  ;;  %v1589_v14 = vsel %vm363_vm1, %v371_v61, 0.0  ;;  %v414_v42 = vmul.f32 %v1454_v43, %v373_v53  ;;  %v420_v46 = vadd.f32 %v413_v17, %v402_v25 }
  0xa0   : > { %v438_v30 = vmul.f32 %v1445_v39, %v362_v12  ;;  %v489_v33 = vmul.f32 %v1448_v40, %v362_v12  ;;  %v1599_v34 = vsel %vm346_vm0, %v353_v23, 0.0  ;;  %v432_v57 = vmul.f32 %v1445_v39, %v356_v15 }
  0xa1   : > { %v451_v61 = vadd.f32 %v443_v58, %v431_v19  ;;  %v464_v13 = vmul.f32 %v1457_v44, %v373_v53  ;;  %v483_v12 = vmul.f32 %v1448_v40, %v356_v15  ;;  %v494_v23 = vmul.f32 %v1441_v35, %v1483_v60 }
  0xa2   : > { %v1604_v16 = vadd.f32 %v450_v0, %v438_v30  ;;  %v1606_v52 = vadd.f32 %v500_v7, %v489_v33  ;;  %v512_v32 = vmul.f32 %v1460_v45, %v373_v53  ;;  %v452_v17 = vadd.f32 %v444_v6, %v432_v57 }
  0xa3   : > { %v471_v1 = vadd.f32 %v463_v8, %v451_v61  ;;  %v502_v58 = vadd.f32 %v1469_v50, %v1491_v63  ;;  %v513_v62 = vmul.f32 %v1460_v45, %v1481_v59  ;;  %v2020_v19 = vrot.slane %v1476_v56, 1 }
  0xa4   : > { %v403_v15 = vadd.f32 %v1509_v5, %v385_v54  ;;  %v501_v7 = vadd.f32 %v494_v23, %v483_v12  ;;  %v472_v8 = vadd.f32 %v464_v13, %v452_v17  ;;  %v433_v35 = vmul.f32 %v1445_v39, %v1474_v55 }
  0xa5   : > { %v375_v0 = vsel %vm363_vm1, %v2020_v19, 0.0  ;;  %v465_v60 = vmul.f32 %v1457_v44, %v1481_v59  ;;  %v520_v6 = vadd.f32 %v513_v62, %v502_v58  ;;  %v485_v63 = vmul.f32 %v1448_v40, %v1516_v9 }
  0xa6   : > { %v421_v50 = vadd.f32 %v414_v42, %v403_v15  ;;  %v514_v56 = vmul.f32 %v1460_v45, %v375_v0  ;;  %v519_v53 = vadd.f32 %v512_v32, %v501_v7  ;;  %v527_v25 = vadd.f32 %v472_v8, %v420_v46 }
  0xa7   : > { %v453_v30 = vadd.f32 %v1466_v49, %v433_v35  ;;  %v376_v5 = vsel %vm363_vm1, %v368_v27, 0.0  ;;  %v503_v54 = vadd.f32 %v1505_v4, %v485_v63  ;;  %v386_v33 = vmul.f32 %v1451_v41, %v1474_v55 }
  0xa8   : > { %v415_v42 = vmul.f32 %v1454_v43, %v1481_v59  ;;  %v434_v57 = vmul.f32 %v1445_v39, %v1516_v9  ;;  %v534_v61 = vadd.f32 %v519_v53, %v471_v1  ;;  %v535_v13 = vadd.f32 %v527_v25, %v520_v6 }
  0xa9   : > { %v473_v32 = vadd.f32 %v465_v60, %v453_v30  ;;  %v466_v46 = vmul.f32 %v1457_v44, %v375_v0  ;;  %v521_v49 = vadd.f32 %v514_v56, %v503_v54  ;;  %v404_v12 = vadd.f32 %v1463_v48, %v386_v33 }
  0xaa   : > { %v454_v27 = vadd.f32 %v1501_v3, %v434_v57  ;;  %v486_v4 = vmul.f32 %v1448_v40, %v1565_v47  ;;  %1169 = vmatprep.mubr.msk.f32.mxu0 %vm550_vm2, %v534_v61  ;;  %v515_v59 = vmul.f32 %v1460_v45, %v376_v5  ;;  %v2021_v23 = vrot.slane %v1519_v10, 1 }
  0xab   : > { %v528_v55 = vadd.f32 %v473_v32, %v421_v50  ;;  %v387_v17 = vmul.f32 %v1451_v41, %v1516_v9  ;;  %1170 = vmatmul.mubr.msk.f32.vlgmr.msra.gmra.mxu0 %vm550_vm2, %v535_v13  ;;  %v422_v48 = vadd.f32 %v415_v42, %v404_v12  ;;  %v416_v62 = vmul.f32 %v1454_v43, %v375_v0 }
  0xac   : > { %v377_v1 = vsel %vm363_vm1, %v2021_v23, 0.0  ;;  %v474_v3 = vadd.f32 %v466_v46, %v454_v27  ;;  %v504_v58 = vadd.f32 %v1560_v38, %v486_v4  ;;  %v435_v10 = vmul.f32 %v1445_v39, %v1565_v47 }
  0xad   : > { %v536_v19 = vadd.f32 %v528_v55, %v521_v49  ;;  %v405_v15 = vadd.f32 %v1497_v2, %v387_v17  ;;  %v467_v7 = vmul.f32 %v1457_v44, %v376_v5  ;;  %v487_v9 = vmul.f32 %v1448_v40, %v1552_v36  ;;  %v689_v17 = vld [vmem:[%s2011_s4 + $0x4] sm:$0x7] }
  0xae   : > { %v522_v8 = vadd.f32 %v515_v59, %v504_v58  ;;  %v529_v35 = vadd.f32 %v474_v3, %v422_v48  ;;  %v516_v60 = vmul.f32 %v1460_v45, %v377_v1  ;;  %v455_v0 = vadd.f32 %v1556_v37, %v435_v10  ;;  %v690_v3 = vld [vmem:[%s2011_s4 + $0x8] sm:$0x7] }
  0xaf   : > { %1172 = vmatprep.mubr.msk.f32.mxu0 %vm550_vm2, %v536_v19  ;;  %v423_v38 = vadd.f32 %v416_v62, %v405_v15  ;;  %v2022_v6 = vrot.slane %v1568_v51, 1  ;;  %v388_v50 = vmul.f32 %v1451_v41, %v1565_v47  ;;  %v505_v56 = vadd.f32 %v1542_v18, %v487_v9 }
  0xb0   : > { %v537_v63 = vadd.f32 %v529_v35, %v522_v8  ;;  %v417_v53 = vmul.f32 %v1454_v43, %v376_v5  ;;  %v436_v25 = vmul.f32 %v1445_v39, %v1552_v36  ;;  %v475_v30 = vadd.f32 %v467_v7, %v455_v0  ;;  %v2023_v0 = vld [vmem:[#allocation5_spill] sm:$0xff] }
  0xb1   : > { %v378_v2 = vsel %vm363_vm1, %v2022_v6, 0.0  ;;  %v406_v54 = vadd.f32 %v1548_v29, %v388_v50  ;;  %v468_v37 = vmul.f32 %v1457_v44, %v377_v1  ;;  %v488_v51 = vmul.f32 %v1448_v40, %v1599_v34 }
  0xb2   : > { %1173 = vmatmul.mubr.msk.f32.gmra.mxu0 %vm550_vm2, %v537_v63  ;;  %v523_v33 = vadd.f32 %v516_v60, %v505_v56  ;;  %v456_v47 = vadd.f32 %v1538_v22, %v436_v25  ;;  %v517_v18 = vmul.f32 %v1460_v45, %v378_v2  ;;  %v389_v5 = vmul.f32 %v1451_v41, %v1552_v36 }
  0xb3   : > { %v530_v42 = vadd.f32 %v475_v30, %v423_v38  ;;  %v424_v57 = vadd.f32 %v417_v53, %v406_v54  ;;  %v506_v61 = vadd.f32 %v1593_v20, %v488_v51  ;;  %v418_v29 = vmul.f32 %v1454_v43, %v377_v1 }
  0xb4   : > { %v476_v13 = vadd.f32 %v468_v37, %v456_v47  ;;  %v407_v32 = vadd.f32 %v1534_v21, %v389_v5  ;;  %v437_v40 = vmul.f32 %v1445_v39, %v1599_v34  ;;  %v469_v46 = vmul.f32 %v1457_v44, %v378_v2 }
  0xb5   : > { %v538_v22 = vadd.f32 %v530_v42, %v523_v33  ;;  %v524_v49 = vadd.f32 %v517_v18, %v506_v61  ;;  %v518_v12 = vmul.f32 %v1460_v45, %v1589_v14  ;;  %v390_v36 = vmul.f32 %v1451_v41, %v1599_v34 }
  0xb6   : > { %v531_v27 = vadd.f32 %v476_v13, %v424_v57  ;;  %v457_v20 = vadd.f32 %v1583_v24, %v437_v40  ;;  %v419_v4 = vmul.f32 %v1454_v43, %v378_v2  ;;  %v470_v39 = vmul.f32 %v1457_v44, %v1589_v14  ;;  %v886_v44 = vld [vmem:[%s2012_s5 + $0x8] sm:$0xff]  ;;  %v688_v14 = vld [vmem:[%s2011_s4] sm:$0x7] }
  0xb7   : > { %1175 = vmatprep.mubr.msk.f32.mxu0 %vm550_vm2, %v538_v22  ;;  %v408_v21 = vadd.f32 %v1579_v11, %v390_v36  ;;  %v425_v59 = vadd.f32 %v418_v29, %v407_v32  ;;  %v525_v45 = vadd.f32 %v518_v12, %v1606_v52  ;;  %1181 = vmatprep.subr.mxu1 %v886_v44  ;;  %v885_v11 = vld [vmem:[%s2012_s5] sm:$0xff] }
  0xb8   : > { %v539_v55 = vadd.f32 %v531_v27, %v524_v49  ;;  %v477_v23 = vadd.f32 %v469_v46, %v457_v20  ;;  %v478_v41 = vadd.f32 %v470_v39, %v1604_v16  ;;  %1182 = vmatpush3.msra.mxu1 %v886_v44  ;;  %v1713_v16 = vld [vmem:[%s2010_s3] ss:$0 sm:$0xff]  ;;  %v1726_v58 = vrot.slane %v688_v14, %v1419_v28 }
  0xb9   : > { %v426_v1 = vadd.f32 %v419_v4, %v408_v21  ;;  %1183 = vmatprep.subr.mxu1 %v885_v11  ;;  %v1729_v15 = vrot.slane %v689_v17, %v1419_v28  ;;  %v1733_v7 = vrot.slane %v689_v17, %v1428_v31  ;;  %v1736_v8 = vrot.slane %v690_v3, %v1428_v31 }
  0xba   : > { %1176 = vmatmul.mubr.msk.f32.gmra.mxu0 %vm550_vm2, %v539_v55  ;;  %v532_v24 = vadd.f32 %v477_v23, %v425_v59  ;;  %1184 = vmatpush3.msra.mxu1 %v885_v11  ;;  %v1739_v35 = vrot.slane %v690_v3, %v1419_v28  ;;  %v1742_v38 = vrot.slane %v688_v14, %v1428_v31 }
  0xbb   : > { %v533_v43 = vadd.f32 %v478_v41, %v426_v1  ;;  %v1745_v6 = vrot.slane %v688_v14, %v2023_v0  ;;  %v1751_v56 = vrot.slane %v689_v17, %v2023_v0  ;;  %v1754_v53 = vrot.slane %v690_v3, %v2023_v0 }
  0xbc   : > { %v540_v34 = vadd.f32 %v532_v24, %v525_v45 }
  0xbe   : > { %1178 = vmatprep.mubr.msk.f32.mxu0 %vm550_vm2, %v540_v34 }
  0xbf   : > { %1179 = vmatmul.mubr.msk.f32.gmra.mxu0 %vm550_vm2, %v533_v43 }
 0x16b   : > { %v1171_v52 = vpop.f32.mrf.mxu0 }
 0x16c   : > { %v647_v48 = vadd.f32 %v1171_v52, %v1713_v16 }
 0x16d   : > { %v641_v62 = vpop.f32.mrf.mxu0 }
 0x16e   : > { %v681_v19 = vmax.f32 %v647_v48, 0.0  ;;  %v642_v10 = vadd.f32 %v1713_v16, %v641_v62 }
 0x170   : > { %v680_v9 = vmax.f32 %v642_v10, 0.0  ;;  %v692_v60 = vrot.slane %v681_v19, 7  ;;  %v1748_v2 = vmul.f32 %v1726_v58, %v681_v19  ;;  %v708_v63 = vrot.slane %v681_v19, 1 }
 0x171   : > { %v787_v28 = vmul.f32 %v1729_v15, %v681_v19  ;;  %v837_v47 = vmul.f32 %v1739_v35, %v681_v19 }
 0x172   : > { %v1174_v50 = vpop.f32.mrf.mxu0  ;;  %v691_v25 = vrot.slane %v680_v9, 7  ;;  %v700_v30 = vsel %vm346_vm0, %v692_v60, 0.0  ;;  %v738_v54 = vmul.f32 %v1726_v58, %v680_v9  ;;  %v707_v51 = vrot.slane %v680_v9, 1 }
 0x173   : > { %v657_v31 = vadd.f32 %v1174_v50, %v1713_v16  ;;  %v716_v33 = vsel %vm363_vm1, %v708_v63, 0.0  ;;  %v728_v57 = vmul.f32 %v1742_v38, %v700_v30  ;;  %v786_v32 = vmul.f32 %v1729_v15, %v680_v9 }
 0x174   : > { %v651_v37 = vpop.f32.mrf.mxu0  ;;  %v699_v42 = vsel %vm346_vm0, %v691_v25, 0.0  ;;  %v715_v61 = vsel %vm363_vm1, %v707_v51, 0.0  ;;  %v757_v22 = vmul.f32 %v1745_v6, %v716_v33  ;;  %v775_v49 = vmul.f32 %v1733_v7, %v700_v30 }
 0x175   : > { %v1764_v18 = vmax.f32 %v657_v31, 0.0  ;;  %v652_v5 = vadd.f32 %v1713_v16, %v651_v37  ;;  %v727_v29 = vmul.f32 %v1742_v38, %v699_v42  ;;  %v774_v13 = vmul.f32 %v1733_v7, %v699_v42 }
 0x176   : > { %v756_v21 = vmul.f32 %v1745_v6, %v715_v61  ;;  %v806_v39 = vmul.f32 %v1751_v56, %v715_v61  ;;  %v826_v55 = vmul.f32 %v1736_v8, %v700_v30  ;;  %v807_v41 = vmul.f32 %v1751_v56, %v716_v33 }
 0x177   : > { %v694_v40 = vrot.slane %v1764_v18, 7  ;;  %v710_v46 = vrot.slane %v1764_v18, 1  ;;  %v1781_v12 = vmul.f32 %v1726_v58, %v1764_v18  ;;  %v1785_v36 = vmul.f32 %v1729_v15, %v1764_v18 }
 0x178   : > { %v682_v27 = vmax.f32 %v652_v5, 0.0  ;;  %v794_v20 = vadd.f32 %v786_v32, %v774_v13  ;;  %v745_v4 = vadd.f32 %v738_v54, %v727_v29  ;;  %v844_v44 = vadd.f32 %v837_v47, %v826_v55 }
 0x179   : > { %v1792_v59 = vsel %vm346_vm0, %v694_v40, 0.0  ;;  %v855_v52 = vmul.f32 %v1754_v53, %v716_v33  ;;  %v795_v48 = vadd.f32 %v787_v28, %v775_v49  ;;  %v718_v30 = vsel %vm363_vm1, %v710_v46, 0.0 }
 0x17a   : > { %v693_v23 = vrot.slane %v682_v27, 7  ;;  %v709_v45 = vrot.slane %v682_v27, 1  ;;  %v1177_v1 = vpop.f32.mrf.mxu0  ;;  %v1796_v24 = vmul.f32 %v1726_v58, %v682_v27  ;;  %v814_v43 = vadd.f32 %v806_v39, %v794_v20 }
 0x17b   : > { %v667_v34 = vadd.f32 %v1177_v1, %v1713_v16  ;;  %v788_v3 = vmul.f32 %v1729_v15, %v682_v27  ;;  %v763_v9 = vadd.f32 %v756_v21, %v745_v4  ;;  %v862_v60 = vadd.f32 %v855_v52, %v844_v44 }
 0x17c   : > { %v701_v11 = vsel %vm346_vm0, %v693_v23, 0.0  ;;  %v661_v14 = vpop.f32.mrf.mxu0  ;;  %v1804_v17 = vsel %vm363_vm1, %v709_v45, 0.0  ;;  %v815_v0 = vadd.f32 %v807_v41, %v795_v48  ;;  %v838_v50 = vmul.f32 %v1739_v35, %v682_v27 }
 0x17d   : > { %v1807_v62 = vmax.f32 %v667_v34, 0.0  ;;  %v662_v19 = vadd.f32 %v1713_v16, %v661_v14  ;;  %v827_v10 = vmul.f32 %v1736_v8, %v701_v11  ;;  %v856_v28 = vmul.f32 %v1754_v53, %v1804_v17 }
 0x17e   : > { %v877_v51 = vadd.f32 %v862_v60, %v814_v43  ;;  %v746_v61 = vadd.f32 %v1748_v2, %v728_v57  ;;  %v776_v29 = vmul.f32 %v1733_v7, %v701_v11  ;;  %v870_v46 = vadd.f32 %v815_v0, %v763_v9 }
 0x17f   : > { %v696_v63 = vrot.slane %v1807_v62, 7  ;;  %v712_v25 = vrot.slane %v1807_v62, 1  ;;  %v1180_v31 = vpop.f32.mrf.mxu0  ;;  %v684_v54 = vmax.f32 %v662_v19, 0.0  ;;  %v845_v33 = vadd.f32 %v838_v50, %v827_v10 }
 0x180   : > { %v677_v37 = vadd.f32 %v1180_v31, %v1713_v16  ;;  %v1821_v47 = vmul.f32 %v1726_v58, %v1807_v62  ;;  %v1825_v5 = vmul.f32 %v1729_v15, %v1807_v62  ;;  %1185 = vmatprep.mubr.msk.f32.mxu1 %vm894_vm3, %v877_v51  ;;  %v764_v57 = vadd.f32 %v757_v22, %v746_v61 }
 0x181   : > { %v671_v42 = vpop.f32.mrf.mxu0  ;;  %v1831_v13 = vsel %vm346_vm0, %v696_v63, 0.0  ;;  %v695_v32 = vrot.slane %v684_v54, 7  ;;  %v711_v40 = vrot.slane %v684_v54, 1  ;;  %v1835_v49 = vmul.f32 %v1726_v58, %v684_v54 }
 0x182   : > { %v687_v27 = vmax.f32 %v677_v37, 0.0  ;;  %v672_v20 = vadd.f32 %v1713_v16, %v671_v42  ;;  %v863_v4 = vadd.f32 %v856_v28, %v845_v33  ;;  %v790_v2 = vmul.f32 %v1729_v15, %v684_v54 }
 0x183   : > { %v796_v21 = vadd.f32 %v788_v3, %v776_v29  ;;  %v808_v39 = vmul.f32 %v1751_v56, %v1804_v17  ;;  %v703_v55 = vsel %vm346_vm0, %v695_v32, 0.0  ;;  %v828_v1 = vmul.f32 %v1736_v8, %v1792_v59 }
 0x184   : > { %v698_v23 = vrot.slane %v687_v27, 7  ;;  %v714_v45 = vrot.slane %v687_v27, 1  ;;  %v1846_v41 = vmul.f32 %v1729_v15, %v687_v27  ;;  %v1848_v16 = vmax.f32 %v672_v20, 0.0 }
 0x185   : > { %v878_v34 = vadd.f32 %v870_v46, %v863_v4  ;;  %v816_v43 = vadd.f32 %v808_v39, %v796_v21  ;;  %v843_v14 = vmul.f32 %v1739_v35, %v687_v27  ;;  %v839_v52 = vmul.f32 %v1739_v35, %v1764_v18 }
 0x186   : > { %v706_v22 = vsel %vm346_vm0, %v698_v23, 0.0  ;;  %v1854_v44 = vsel %vm363_vm1, %v714_v45, 0.0  ;;  %v697_v3 = vrot.slane %v1848_v16, 7  ;;  %v857_v19 = vmul.f32 %v1754_v53, %v718_v30 }
 0x187   : > { %v832_v48 = vmul.f32 %v1736_v8, %v706_v22  ;;  %1186 = vmatmul.mubr.msk.f32.vlgmr.msra.gmra.mxu1 %vm894_vm3, %v878_v34  ;;  %v719_v10 = vsel %vm363_vm1, %v711_v40, 0.0  ;;  %v781_v9 = vmul.f32 %v1733_v7, %v706_v22  ;;  %v846_v60 = vadd.f32 %v839_v52, %v828_v1 }
 0x188   : > { %v871_v0 = vadd.f32 %v816_v43, %v764_v57  ;;  %v729_v50 = vmul.f32 %v1742_v38, %v701_v11  ;;  %v705_v18 = vsel %vm346_vm0, %v697_v3, 0.0  ;;  %v713_v31 = vrot.slane %v1848_v16, 1 }
 0x189   : > { %v1867_v63 = vadd.f32 %v843_v14, %v832_v48  ;;  %v792_v28 = vmul.f32 %v1729_v15, %v1848_v16  ;;  %v864_v37 = vadd.f32 %v857_v19, %v846_v60  ;;  %v758_v33 = vmul.f32 %v1745_v6, %v1804_v17 }
 0x18a   : > { %v747_v51 = vadd.f32 %v1796_v24, %v729_v50  ;;  %v777_v42 = vmul.f32 %v1733_v7, %v1792_v59  ;;  %v809_v11 = vmul.f32 %v1751_v56, %v718_v30  ;;  %v829_v61 = vmul.f32 %v1736_v8, %v703_v55 }
 0x18b   : > { %v840_v29 = vmul.f32 %v1739_v35, %v684_v54  ;;  %v720_v32 = vsel %vm363_vm1, %v712_v25, 0.0  ;;  %v879_v40 = vadd.f32 %v871_v0, %v864_v37  ;;  %v730_v24 = vmul.f32 %v1742_v38, %v1792_v59 }
 0x18c   : > { %v765_v15 = vadd.f32 %v758_v33, %v747_v51  ;;  %v797_v46 = vadd.f32 %v1785_v36, %v777_v42  ;;  %v858_v27 = vmul.f32 %v1754_v53, %v719_v10  ;;  %v759_v20 = vmul.f32 %v1745_v6, %v718_v30 }
 0x18d   : > { %v847_v17 = vadd.f32 %v840_v29, %v829_v61  ;;  %v778_v4 = vmul.f32 %v1733_v7, %v703_v55  ;;  %1188 = vmatprep.mubr.msk.f32.mxu1 %vm894_vm3, %v879_v40  ;;  %v748_v57 = vadd.f32 %v1781_v12, %v730_v24  ;;  %v830_v25 = vmul.f32 %v1736_v8, %v1831_v13 }
 0x18e   : > { %v817_v54 = vadd.f32 %v809_v11, %v797_v46  ;;  %v841_v36 = vmul.f32 %v1739_v35, %v1807_v62  ;;  %v810_v39 = vmul.f32 %v1751_v56, %v719_v10  ;;  %v859_v23 = vmul.f32 %v1754_v53, %v720_v32 }
 0x18f   : > { %v865_v21 = vadd.f32 %v858_v27, %v847_v17  ;;  %v798_v59 = vadd.f32 %v790_v2, %v778_v4  ;;  %v721_v1 = vsel %vm363_vm1, %v713_v31, 0.0  ;;  %v731_v34 = vmul.f32 %v1742_v38, %v703_v55 }
 0x190   : > { %v872_v30 = vadd.f32 %v817_v54, %v765_v15  ;;  %v848_v45 = vadd.f32 %v841_v36, %v830_v25  ;;  %v766_v12 = vadd.f32 %v759_v20, %v748_v57  ;;  %v760_v22 = vmul.f32 %v1745_v6, %v719_v10 }
 0x191   : > { %v818_v43 = vadd.f32 %v810_v39, %v798_v59  ;;  %v779_v62 = vmul.f32 %v1733_v7, %v1831_v13  ;;  %v749_v2 = vadd.f32 %v1835_v49, %v731_v34  ;;  %v811_v52 = vmul.f32 %v1751_v56, %v720_v32 }
 0x192   : > { %v880_v14 = vadd.f32 %v872_v30, %v865_v21  ;;  %v831_v48 = vmul.f32 %v1736_v8, %v705_v18  ;;  %v866_v3 = vadd.f32 %v859_v23, %v848_v45  ;;  %v842_v55 = vmul.f32 %v1739_v35, %v1848_v16 }
 0x193   : > { %v873_v19 = vadd.f32 %v818_v43, %v766_v12  ;;  %v799_v26 = vadd.f32 %v1825_v5, %v779_v62  ;;  %v767_v10 = vadd.f32 %v760_v22, %v749_v2  ;;  %v860_v60 = vmul.f32 %v1754_v53, %v721_v1 }
 0x194   : > { %1189 = vmatmul.mubr.msk.f32.gmra.mxu1 %vm894_vm3, %v880_v14  ;;  %v732_v0 = vmul.f32 %v1742_v38, %v1831_v13  ;;  %v780_v49 = vmul.f32 %v1733_v7, %v705_v18  ;;  %v849_v8 = vadd.f32 %v842_v55, %v831_v48  ;;  %v761_v37 = vmul.f32 %v1745_v6, %v720_v32 }
 0x195   : > { %v881_v50 = vadd.f32 %v873_v19, %v866_v3  ;;  %v819_v31 = vadd.f32 %v811_v52, %v799_v26  ;;  %v812_v35 = vmul.f32 %v1751_v56, %v721_v1  ;;  %v733_v33 = vmul.f32 %v1742_v38, %v705_v18 }
 0x196   : > { %v750_v5 = vadd.f32 %v1821_v47, %v732_v0  ;;  %v800_v51 = vadd.f32 %v792_v28, %v780_v49  ;;  %v801_v42 = vadd.f32 %v1846_v41, %v781_v9  ;;  %v867_v11 = vadd.f32 %v860_v60, %v849_v8 }
 0x197   : > { %1191 = vmatprep.mubr.msk.f32.mxu1 %vm894_vm3, %v881_v50  ;;  %v874_v13 = vadd.f32 %v819_v31, %v767_v10  ;;  %v744_v7 = vmul.f32 %v1726_v58, %v1848_v16  ;;  %v861_v47 = vmul.f32 %v1754_v53, %v1854_v44  ;;  %v762_v38 = vmul.f32 %v1745_v6, %v721_v1  ;;  %v1132_v6 = vld [vmem:[%s2013_s6] ss:$0 sm:$0xff] }
 0x198   : > { %v768_v61 = vadd.f32 %v761_v37, %v750_v5  ;;  %v820_v29 = vadd.f32 %v812_v35, %v800_v51  ;;  %v813_v41 = vmul.f32 %v1751_v56, %v1854_v44 }
 0x199   : > { %v882_v28 = vadd.f32 %v874_v13, %v867_v11  ;;  %v751_v32 = vadd.f32 %v744_v7, %v733_v33  ;;  %v868_v9 = vadd.f32 %v861_v47, %v1867_v63 }
 0x19a   : > { %v875_v18 = vadd.f32 %v820_v29, %v768_v61  ;;  %v821_v16 = vadd.f32 %v813_v41, %v801_v42 }
 0x19b   : > { %1192 = vmatmul.mubr.msk.f32.gmra.mxu1 %vm894_vm3, %v882_v28  ;;  %v769_v58 = vadd.f32 %v762_v38, %v751_v32 }
 0x19c   : > { %v883_v40 = vadd.f32 %v875_v18, %v868_v9 }
 0x19d   : > { %v876_v15 = vadd.f32 %v821_v16, %v769_v58 }
 0x19e   : > { %1194 = vmatprep.mubr.msk.f32.mxu1 %vm894_vm3, %v883_v40 }
 0x19f   : > { %1195 = vmatmul.mubr.msk.f32.gmra.mxu1 %vm894_vm3, %v876_v15 }
 0x247   : > { %v1187_v56 = vpop.f32.mrf.mxu1 }
 0x248   : > { %v991_v53 = vadd.f32 %v1187_v56, %v1132_v6 }
 0x249   : > { %v985_v44 = vpop.f32.mrf.mxu1 }
 0x24a   : > { %v1025_v63 = vmax.f32 %v991_v53, 0.0  ;;  %v986_v46 = vadd.f32 %v1132_v6, %v985_v44 }
 0x24c   : > { %1033 = vst.msk [vmem:[%s1938_s15 + $0x8] sm:$0xff] %vm894_vm3, %v1025_v63  ;;  %v1024_v24 = vmax.f32 %v986_v46, 0.0 }
 0x24e   : > { %1032 = vst.msk [vmem:[%s1938_s15] sm:$0xff] %vm894_vm3, %v1024_v24 }
 0x254   : > { %v1190_v17 = vpop.f32.mrf.mxu1 }
 0x255   : > { %v1001_v27 = vadd.f32 %v1190_v17, %v1132_v6 }
 0x256   : > { %v995_v20 = vpop.f32.mrf.mxu1 }
 0x257   : > { %v1027_v4 = vmax.f32 %v1001_v27, 0.0  ;;  %v996_v54 = vadd.f32 %v1132_v6, %v995_v20 }
 0x259   : > { %1035 = vst.msk [vmem:[%s1938_s15 + $0x18] sm:$0xff] %vm894_vm3, %v1027_v4  ;;  %v1026_v57 = vmax.f32 %v996_v54, 0.0 }
 0x25b   : > { %1034 = vst.msk [vmem:[%s1938_s15 + $0x10] sm:$0xff] %vm894_vm3, %v1026_v57  ;;  %v1193_v25 = vpop.f32.mrf.mxu1 }
 0x25c   : > { %v1011_v36 = vadd.f32 %v1193_v25, %v1132_v6 }
 0x25d   : > { %v1005_v21 = vpop.f32.mrf.mxu1 }
 0x25e   : > { %v1029_v59 = vmax.f32 %v1011_v36, 0.0  ;;  %v1006_v39 = vadd.f32 %v1132_v6, %v1005_v21 }
 0x25f   : > { %v1196_v23 = vpop.f32.mrf.mxu1 }
 0x260   : > { %1037 = vst.msk [vmem:[%s1938_s15 + $0x28] sm:$0xff] %vm894_vm3, %v1029_v59  ;;  %v1028_v30 = vmax.f32 %v1006_v39, 0.0  ;;  %v1021_v45 = vadd.f32 %v1196_v23, %v1132_v6 }
 0x261   : > { %v1015_v1 = vpop.f32.mrf.mxu1 }
 0x262   : > { %1036 = vst.msk [vmem:[%s1938_s15 + $0x20] sm:$0xff] %vm894_vm3, %v1028_v30  ;;  %v1031_v34 = vmax.f32 %v1021_v45, 0.0  ;;  %v1016_v12 = vadd.f32 %v1132_v6, %v1015_v1 }
 0x264   : > { %1039 = vst.msk [vmem:[%s1938_s15 + $0x38] sm:$0xff] %vm894_vm3, %v1031_v34  ;;  %v1030_v43 = vmax.f32 %v1016_v12, 0.0 }
 0x266   : > { %1038 = vst.msk [vmem:[%s1938_s15 + $0x30] sm:$0xff] %vm894_vm3, %v1030_v43 }
 0x267   : > { %1252 = shalt.err (!%p1249_p3)
}
 0x268   : > { %s1253_s8 = scalar_lea.hbm %s1957_s20, 1024  ;;  %s1257_s14 = scalar_lea.hbm %s2014_s7, 2048 }
 0x269   : > { %p1254_p4 = scmp.ne.s32.totalorder %s1957_s20, %s1253_s8  ;;  %p1258_p9 = scmp.lt.s32.totalorder %s1957_s20, %s2014_s7 }
 0x26a   : > { %p1259_p10 = scmp.lt.s32.totalorder %s1257_s14, %s1253_s8 }
 0x26b   : > { %p1255_p7 = pnand %p1254_p4, %p1383_p5 }
 0x26c   : > { %p1260_p11 = por %p1259_p10, %p1258_p9 }
 0x26d   : > { %p1256_p8 = pneg %p1255_p7 }
 0x26f   : > { %p1261_p12 = pnand %p1260_p11, %p1256_p8 }
 0x271   : > { %1264 = shalt.err (!%p1261_p12)
}
 0x272   : > { %s1303_s18 = smov 128   ;;  %s1304_s19 = smov 8  }
 0x273   : > { %1197 = dma.vmem_to_hbm [thread:$0]  (%p1383_p5), %s1959_s17, 1024, %s1957_s20, %s1967_s28, %s1303_s18, %s1303_s18, %s1304_s19  }
 0x274 PF: > { %p1203_p13 = scmp.ge.s32.totalorder %s1299_s27, 2  ;;  %s1069_s21 = sand.u32 1, %s1287_s24  }
 0x275   : > { %s1070_s22 = scalar_lea.sflag [#allocation3], %s1069_s21 }
 0x276   : > { %p1200_p0 = pnand %p1203_p13, %p1387_p6 }
 0x278   : > { %p1201_p1 = pneg %p1200_p0 }
 0x27a   : > { %1282 = dma.done.wait (%p1201_p1), %s1070_s22, 1024  }
 0x27b   : > { %1284 = vsyncadd (%p1201_p1), %s1070_s22, 4294966272  ;;  %p17_p2 = scmp.ge.s32.totalorder %s1370_s30, 4   ;;  %s2024_s24 = smov %s1291_s25 }
 0x27c   : > { %s2025_s25 = smov %s1295_s26  ;;  %s2026_s26 = smov %s1381_s10 }
 0x27d   : > { %s2027_s27 = smov %s1370_s30  ;;  %19 = sbr.rel (!%p17_p2) target bundleno = 3 (0x3), region = 83 }
 0x282   :  { %1075 = vsyncpa [#allocation3], 1 }
 0x283   :  { %1077 = vsyncpa [#allocation3 + $0x1], 1 }

</bundles_post_ra>
